<compile_context>
chip_gen: v7x
topology: tpu7x:2x2x1
jax: 0.10.0
libtpu: 0.0.40
codegen_flags: <defaults>
</compile_context>

<pallas_src>
import numpy as np
import jax
import jax.numpy as jnp
from jax.experimental import pallas as pl
from jax.experimental.pallas import tpu as pltpu

# ----- small config consistent with DefaultFrontend / InterpLnr -----
FS = 2000            # sampling rate (small)
N_FFT = 128          # (module default 1024; scaled down)
WIN_LENGTH = 64      # (module default 800)
HOP_LENGTH = 32      # (module default 160)
N_MELS = 16          # (module default 80)
MAX_LEN_PAD = 192    # InterpLnr.max_len_pad
MIN_LEN_SEG = 19     # InterpLnr.min_len_seg
MAX_LEN_SEG = 32     # InterpLnr.max_len_seg
MAX_NUM_SEG = 1      # 1 // 19 + 1 (computed at __init__, never recomputed)


# ------------------------- deterministic "weights" -------------------------
def _hz_to_mel(f):
    f = np.asarray(f, dtype=np.float64)
    f_sp = 200.0 / 3
    mels = f / f_sp
    min_log_hz = 1000.0
    min_log_mel = min_log_hz / f_sp
    logstep = np.log(6.4) / 27.0
    return np.where(f >= min_log_hz,
                    min_log_mel + np.log(np.maximum(f, 1e-10) / min_log_hz) / logstep,
                    mels)


def _mel_to_hz(m):
    m = np.asarray(m, dtype=np.float64)
    f_sp = 200.0 / 3
    freqs = f_sp * m
    min_log_hz = 1000.0
    min_log_mel = min_log_hz / f_sp
    logstep = np.log(6.4) / 27.0
    return np.where(m >= min_log_mel,
                    min_log_hz * np.exp(logstep * (m - min_log_mel)),
                    freqs)


def mel_filterbank(fs, n_fft, n_mels, fmin, fmax):
    """librosa-style slaney mel filterbank, norm=1 (slaney). Returns (F, n_mels)."""
    n_freq = n_fft // 2 + 1
    fftfreqs = np.linspace(0.0, fs / 2.0, n_freq)
    mels = np.linspace(_hz_to_mel(fmin), _hz_to_mel(fmax), n_mels + 2)
    mel_f = _mel_to_hz(mels)
    fdiff = np.diff(mel_f)
    ramps = mel_f[:, None] - fftfreqs[None, :]
    weights = np.zeros((n_mels, n_freq))
    for i in range(n_mels):
        lower = -ramps[i] / fdiff[i]
        upper = ramps[i + 2] / fdiff[i + 1]
        weights[i] = np.maximum(0.0, np.minimum(lower, upper))
    enorm = 2.0 / (mel_f[2:n_mels + 2] - mel_f[:n_mels])   # norm=1 (slaney area norm)
    weights *= enorm[:, None]
    return weights.T.astype(np.float32)


def stft_matrices(n_fft, win_length):
    """Window-folded real DFT matrices: real = frame @ cosW, imag = frame @ sinW."""
    n = np.arange(win_length)
    win = 0.5 - 0.5 * np.cos(2.0 * np.pi * n / win_length)   # periodic hann (torch default)
    pad_left = (n_fft - win_length) // 2
    win_pad = np.zeros(n_fft)
    win_pad[pad_left:pad_left + win_length] = win
    nn = np.arange(n_fft)[:, None]
    ff = np.arange(n_fft // 2 + 1)[None, :]
    ang = 2.0 * np.pi * nn * ff / n_fft
    cosw = (win_pad[:, None] * np.cos(ang)).astype(np.float32)
    sinw = (-win_pad[:, None] * np.sin(ang)).astype(np.float32)
    return cosw, sinw


# ------------------------- framing glue (plain JAX) -------------------------
def frame_signal(x, n_fft, hop):
    """center=True, pad_mode='reflect' framing (torch.stft semantics)."""
    B, N = x.shape
    pad = n_fft // 2
    assert N > pad, "reflect padding requires input length > n_fft // 2"
    xp = jnp.pad(x, ((0, 0), (pad, pad)), mode='reflect')
    T = N // hop + 1
    idx = jnp.arange(T)[:, None] * hop + jnp.arange(n_fft)[None, :]
    return xp[:, idx], T                                 # (B, T, n_fft)


def _pick_bblk(B):
    """Fold several batch items per grid step (per-step overhead ~0.35us dwarfs the per-step
    compute at these sizes), but keep >= 2 grid steps so both v7x TensorCores get work."""
    for cand in (8, 4, 2):
        if B % cand == 0 and B // cand >= 2:
            return cand
    return 1


# ------------- fused Pallas kernel: STFT power + LogMel + mask + InterpLnr -------------
def frontend_kernel(lens_ref, frames_ref, wcat_ref, melp_ref, interp_ref, out_ref):
    bblk = out_ref.shape[0]
    fp = melp_ref.shape[1]                               # padded freq bins
    tall = frames_ref.shape[2]                           # bblk * Tp (collapsed time, lane axis)
    tp = tall // bblk
    kout = out_ref.shape[2]                              # MAX_LEN_PAD

    # ---- Stft (windowed real DFT), power, mel-fbank, log — all lane-major, batches collapsed
    # onto the lane axis: one fat matmul per stage, no in-kernel transposes. ----
    fr = frames_ref[0]                                   # (n_fft, bblk*Tp), bf16
    reim = jnp.dot(wcat_ref[...], fr, preferred_element_type=jnp.float32)   # (2*Fp, bblk*Tp)
    re = reim[:fp, :]                                    # static, 128-aligned sublane slices
    im = reim[fp:, :]
    power = re * re + im * im                            # |STFT|^2, f32
    mel = jnp.dot(melp_ref[...], power, preferred_element_type=jnp.float32)  # (n_mels, bblk*Tp)
    logmel_t = jnp.log(jnp.maximum(mel, 1e-10))          # LogMel clamp + log (f32)

    base = pl.program_id(0) * bblk
    t_glob = jax.lax.broadcasted_iota(jnp.int32, (tall, kout), 0)   # hoisted out of the loop

    # ---- InterpLnr per batch item: floor/ceil one-hots, lambda, prefix-validity mask and the
    # LogMel feats_lens pad-mask all folded into one (bblk*Tp, MAX_LEN_PAD) weight matrix ->
    # a single MXU matmul and a single unconditional lane-dense (n_mels, 192) store. ----
    for bb in range(bblk):                               # small static unroll (bblk <= 8)
        tbl = interp_ref[bb]                             # (8, Kout) f32: rows [idx, lam, msk, 0...]
        idx = tbl[0:1, :].astype(jnp.int32) + bb * tp    # shift into the collapsed time axis
        lam = tbl[1:2, :]
        msk = tbl[2:3, :]
        w = (jnp.where(t_glob == idx, 1.0 - lam, 0.0)
             + jnp.where(t_glob == idx + 1, lam, 0.0)) * msk
        # LogMel pad-mask (reference fills padded frames with 0.0) folded in: zero weights that
        # would read rows >= feats_lens of this utterance.
        w = jnp.where(t_glob < lens_ref[base + bb] + bb * tp, w, 0.0)
        out_ref[bb] = jnp.dot(logmel_t, w, preferred_element_type=jnp.float32)  # (n_mels, Kout)


def fused_frontend_pallas(feats_lens, frames_t, wcat_t, melp_t, interp, bblk):
    G, n_fft, tall = frames_t.shape
    F2 = wcat_t.shape[0]
    n_mels, fp = melp_t.shape
    B, rows, kout = interp.shape
    return pl.pallas_call(
        frontend_kernel,
        out_shape=jax.ShapeDtypeStruct((B, n_mels, kout), jnp.float32),
        grid_spec=pltpu.PrefetchScalarGridSpec(
            num_scalar_prefetch=1,                       # feats_lens -> SMEM
            grid=(G,),
            in_specs=[
                pl.BlockSpec((1, n_fft, tall), lambda g, lens: (g, 0, 0)),   # frames (lane-major)
                pl.BlockSpec((F2, n_fft), lambda g, lens: (0, 0)),           # [cos;sin]^T weights
                pl.BlockSpec((n_mels, fp), lambda g, lens: (0, 0)),          # mel filterbank^T
                pl.BlockSpec((bblk, rows, kout), lambda g, lens: (g, 0, 0)),  # packed idx/lam/msk
            ],
            out_specs=pl.BlockSpec((bblk, n_mels, kout), lambda g, lens: (g, 0, 0))),
        compiler_params=pltpu.CompilerParams(
            dimension_semantics=("parallel",)),          # batch-block steps -> v7x's 2 TCs
    )(feats_lens, frames_t, wcat_t, melp_t, interp)


# ------------------------- full DefaultFrontend.forward -------------------------
def default_frontend_forward(waveform, input_lengths, wcat_t, melp_t, rng_key, bblk=None):
    B, N = waveform.shape
    frames, T = frame_signal(waveform, N_FFT, HOP_LENGTH)        # (B, T, n_fft)
    Tp = ((T + 7) // 8) * 8
    frames = jnp.pad(frames, ((0, 0), (0, Tp - T), (0, 0)))

    if bblk is None:
        bblk = _pick_bblk(B)
    G = B // bblk
    # Lane-major layout for the kernel: time (of each batch-block) on the lane axis. Pure
    # layout plumbing in XLA; keeps every in-kernel matmul standard and the output lane-dense.
    frames_t = (frames.reshape(G, bblk, Tp, N_FFT)
                .transpose(0, 3, 1, 2)
                .reshape(G, N_FFT, bblk * Tp)
                .astype(jnp.bfloat16))

    # Stft output lengths (center=True): ilens // hop + 1; LogMel masks padded frames to 0
    # (masking is folded into the interp weight matrix inside the kernel via scalar prefetch).
    feats_lens = (input_lengths // HOP_LENGTH + 1).astype(jnp.int32)

    # InterpLnr random segment parameters (torch.rand / torch.randint analogues).
    k1, k2 = jax.random.split(rng_key)
    scales = jax.random.uniform(k1, (B * MAX_NUM_SEG,), dtype=jnp.float32) + 0.5
    len_seg = jax.random.randint(k2, (B * MAX_NUM_SEG, 1), MIN_LEN_SEG, MAX_LEN_SEG)

    K = MAX_LEN_SEG * 2
    indices = jnp.arange(K, dtype=jnp.float32)[None, :]
    idx_scaled = indices / scales[:, None]
    idx_fl = jnp.floor(idx_scaled)
    lam = idx_scaled - idx_fl

    # exclusive cumulative segment offsets per batch (zeros since max_num_seg == 1)
    len_seg_b = len_seg.reshape(B, MAX_NUM_SEG)
    off = jnp.cumsum(len_seg_b, axis=-1)
    off = jnp.pad(off[:, :-1], ((0, 0), (1, 0))).reshape(-1, 1).astype(jnp.float32)
    idx_org = idx_fl + off

    # max_num_seg == 1 -> the final validity mask is a prefix per row, so the reference's
    # compaction + split + pad_sequences collapses to "write the prefix, zero the rest".
    # (The reference compares against x.size(1) - 1 == T - 1, not per-utterance feats_lens.)
    mask = (idx_fl < (len_seg - 1).astype(jnp.float32)) & (idx_org < jnp.float32(T - 1))

    # Packed side table (B, 8, MAX_LEN_PAD): rows = [floor idx, lambda, mask, 0, 0, 0, 0, 0],
    # entries beyond K carry mask == 0 (matches pad_sequences' zero fill). One DMA per step.
    pad_k = MAX_LEN_PAD - K
    interp = jnp.stack(
        [jnp.pad(idx_org, ((0, 0), (0, pad_k))),
         jnp.pad(lam, ((0, 0), (0, pad_k))),
         jnp.pad(mask.astype(jnp.float32), ((0, 0), (0, pad_k)))],
        axis=1).astype(jnp.float32)                              # (B, 3, MAX_LEN_PAD)
    interp = jnp.pad(interp, ((0, 0), (0, 5), (0, 0)))           # pad rows 3..7 -> tile-aligned

    out_t = fused_frontend_pallas(feats_lens, frames_t, wcat_t, melp_t, interp, bblk)
    input_feats = jnp.transpose(out_t, (0, 2, 1))                # (B, MAX_LEN_PAD, n_mels)
    out_lens = jnp.array([MAX_LEN_PAD], dtype=jnp.int32)         # torch.tensor([feats.size(1)])
    # downsample_rate == 1 -> no extra padding branch.
    return input_feats, out_lens


if __name__ == "__main__":
    key = jax.random.PRNGKey(0)
    k_wave, k_interp = jax.random.split(key)

    B, N = 4, 512
    waveform = jax.random.normal(k_wave, (B, N), dtype=jnp.float32)
    input_lengths = jnp.array([N, 480, N, 448], dtype=jnp.int32)

    cosw_np, sinw_np = stft_matrices(N_FFT, WIN_LENGTH)                      # (n_fft, F)
    melmat_np = mel_filterbank(FS, N_FFT, N_MELS, fmin=0.0, fmax=FS / 2.0)   # (F, n_mels)

    F_bins = cosw_np.shape[1]
    Fp = ((F_bins + 127) // 128) * 128
    # Transposed [cos; sin] DFT weights (2*Fp, n_fft) and mel filterbank (n_mels, Fp):
    # lane-major pipeline needs W^T on the LHS of every matmul.
    wcat_np = np.concatenate(
        [np.pad(cosw_np, ((0, 0), (0, Fp - F_bins))),
         np.pad(sinw_np, ((0, 0), (0, Fp - F_bins)))], axis=1)               # (n_fft, 2*Fp)
    wcat_t_np = wcat_np.T.astype(np.float32)                                 # (2*Fp, n_fft)
    melp_t_np = np.pad(melmat_np, ((0, Fp - F_bins), (0, 0))).T.astype(np.float32)  # (n_mels, Fp)

    feats, feats_lens = default_frontend_forward(
        waveform, input_lengths,
        jnp.asarray(wcat_t_np, dtype=jnp.bfloat16),    # bf16 DFT weights (f32 accumulation)
        jnp.asarray(melp_t_np),                        # mel filterbank stays f32
        k_interp)

    jax.block_until_ready(feats)
    assert feats.shape == (B, MAX_LEN_PAD, N_MELS), feats.shape
    assert feats_lens.shape == (1,), feats_lens.shape
    print("KERNEL_OK")
</pallas_src>

<mosaic_0001>
module attributes {stable_mosaic.version = 11 : i64} {
  func.func @frontend_kernel(%arg0: i32, %arg1: memref<4xi32, #tpu.memory_space<smem>>, %arg2: memref<1x128x48xbf16, #tpu.memory_space<vmem>>, %arg3: memref<256x128xbf16, #tpu.memory_space<vmem>>, %arg4: memref<16x128xf32, #tpu.memory_space<vmem>>, %arg5: memref<2x8x192xf32, #tpu.memory_space<vmem>>, %arg6: memref<2x16x192xf32, #tpu.memory_space<vmem>>) attributes {dimension_semantics = [#tpu.dimension_semantics<parallel>], iteration_bounds = array<i64: 2>, scalar_prefetch = 1 : i64, scratch_operands = 0 : i64, tpu.core_type = #tpu.core_type<tc>, window_params = [{transform_indices = @transform_0, window_bounds = array<i64: 1, 128, 48>}, {pipeline_mode = #tpu.pipeline_mode<synchronous>, transform_indices = @transform_1, window_bounds = array<i64: 256, 128>}, {pipeline_mode = #tpu.pipeline_mode<synchronous>, transform_indices = @transform_2, window_bounds = array<i64: 16, 128>}, {transform_indices = @transform_3, window_bounds = array<i64: 2, 8, 192>}, {transform_indices = @transform_4, window_bounds = array<i64: 2, 16, 192>}]} {
    %c0 = arith.constant 0 : index
    %c0_0 = arith.constant 0 : index
    %c0_1 = arith.constant 0 : index
    %0 = vector.load %arg2[%c0, %c0_0, %c0_1] : memref<1x128x48xbf16, #tpu.memory_space<vmem>>, vector<1x128x48xbf16>
    %1 = vector.shape_cast %0 : vector<1x128x48xbf16> to vector<128x48xbf16>
    %c0_2 = arith.constant 0 : index
    %c0_3 = arith.constant 0 : index
    %2 = vector.load %arg3[%c0_2, %c0_3] : memref<256x128xbf16, #tpu.memory_space<vmem>>, vector<256x128xbf16>
    %cst = arith.constant dense<0.000000e+00> : vector<256x48xf32>
    %3 = tpu.matmul %2, %1, %cst {dimension_numbers = #tpu.dot_dimension_numbers<[1], [0], [0], [1], [0, 0, 1, 1], [], []>} : vector<256x128xbf16>, vector<128x48xbf16>, vector<256x48xf32> -> vector<256x48xf32>
    %4 = vector.extract_strided_slice %3 {offsets = [0, 0], sizes = [128, 48], strides = [1, 1]} : vector<256x48xf32> to vector<128x48xf32>
    %5 = vector.extract_strided_slice %3 {offsets = [128, 0], sizes = [128, 48], strides = [1, 1]} : vector<256x48xf32> to vector<128x48xf32>
    %6 = arith.mulf %4, %4 : vector<128x48xf32>
    %7 = arith.mulf %5, %5 : vector<128x48xf32>
    %8 = arith.addf %6, %7 : vector<128x48xf32>
    %c0_4 = arith.constant 0 : index
    %c0_5 = arith.constant 0 : index
    %9 = vector.load %arg4[%c0_4, %c0_5] : memref<16x128xf32, #tpu.memory_space<vmem>>, vector<16x128xf32>
    %cst_6 = arith.constant dense<0.000000e+00> : vector<16x48xf32>
    %10 = tpu.matmul %9, %8, %cst_6 {dimension_numbers = #tpu.dot_dimension_numbers<[1], [0], [0], [1], [0, 0, 1, 1], [], []>} : vector<16x128xf32>, vector<128x48xf32>, vector<16x48xf32> -> vector<16x48xf32>
    %cst_7 = arith.constant 1.000000e-10 : f32
    %11 = vector.broadcast %cst_7 : f32 to vector<16x48xf32>
    %12 = arith.maximumf %10, %11 : vector<16x48xf32>
    %13 = math.log %12 : vector<16x48xf32>
    %c2_i32 = arith.constant 2 : i32
    %14 = arith.muli %arg0, %c2_i32 : i32
    %15 = tpu.iota {dimensions = array<i32: 0>} : vector<48x192xi32>
    %c0_8 = arith.constant 0 : index
    %c0_9 = arith.constant 0 : index
    %c0_10 = arith.constant 0 : index
    %16 = vector.load %arg5[%c0_8, %c0_9, %c0_10] : memref<2x8x192xf32, #tpu.memory_space<vmem>>, vector<1x8x192xf32>
    %17 = vector.shape_cast %16 : vector<1x8x192xf32> to vector<8x192xf32>
    %18 = vector.extract_strided_slice %17 {offsets = [0, 0], sizes = [1, 192], strides = [1, 1]} : vector<8x192xf32> to vector<1x192xf32>
    %19 = arith.fptosi %18 : vector<1x192xf32> to vector<1x192xi32>
    %c0_i32 = arith.constant 0 : i32
    %20 = vector.broadcast %c0_i32 : i32 to vector<1x192xi32>
    %21 = arith.addi %19, %20 : vector<1x192xi32>
    %22 = vector.extract_strided_slice %17 {offsets = [1, 0], sizes = [1, 192], strides = [1, 1]} : vector<8x192xf32> to vector<1x192xf32>
    %23 = vector.extract_strided_slice %17 {offsets = [2, 0], sizes = [1, 192], strides = [1, 1]} : vector<8x192xf32> to vector<1x192xf32>
    %24 = vector.broadcast %21 : vector<1x192xi32> to vector<48x192xi32>
    %25 = arith.cmpi eq, %15, %24 : vector<48x192xi32>
    %cst_11 = arith.constant 1.000000e+00 : f32
    %26 = vector.broadcast %cst_11 : f32 to vector<1x192xf32>
    %27 = arith.subf %26, %22 : vector<1x192xf32>
    %cst_12 = arith.constant 0.000000e+00 : f32
    %28 = vector.shape_cast %27 : vector<1x192xf32> to vector<1x192xf32>
    %29 = vector.broadcast %28 : vector<1x192xf32> to vector<48x192xf32>
    %30 = vector.broadcast %cst_12 : f32 to vector<48x192xf32>
    %31 = arith.select %25, %29, %30 : vector<48x192xi1>, vector<48x192xf32>
    %c1_i32 = arith.constant 1 : i32
    %32 = vector.broadcast %c1_i32 : i32 to vector<1x192xi32>
    %33 = arith.addi %21, %32 : vector<1x192xi32>
    %34 = vector.broadcast %33 : vector<1x192xi32> to vector<48x192xi32>
    %35 = arith.cmpi eq, %15, %34 : vector<48x192xi32>
    %cst_13 = arith.constant 0.000000e+00 : f32
    %36 = vector.shape_cast %22 : vector<1x192xf32> to vector<1x192xf32>
    %37 = vector.broadcast %36 : vector<1x192xf32> to vector<48x192xf32>
    %38 = vector.broadcast %cst_13 : f32 to vector<48x192xf32>
    %39 = arith.select %35, %37, %38 : vector<48x192xi1>, vector<48x192xf32>
    %40 = arith.addf %31, %39 : vector<48x192xf32>
    %41 = vector.broadcast %23 : vector<1x192xf32> to vector<48x192xf32>
    %42 = arith.mulf %40, %41 : vector<48x192xf32>
    %c0_i32_14 = arith.constant 0 : i32
    %43 = arith.addi %14, %c0_i32_14 : i32
    %44 = arith.index_cast %43 : i32 to index
    %45 = memref.load %arg1[%44] : memref<4xi32, #tpu.memory_space<smem>>
    %c0_i32_15 = arith.constant 0 : i32
    %46 = arith.addi %45, %c0_i32_15 : i32
    %47 = vector.broadcast %46 : i32 to vector<48x192xi32>
    %48 = arith.cmpi slt, %15, %47 : vector<48x192xi32>
    %cst_16 = arith.constant 0.000000e+00 : f32
    %49 = vector.broadcast %cst_16 : f32 to vector<48x192xf32>
    %50 = arith.select %48, %42, %49 : vector<48x192xi1>, vector<48x192xf32>
    %cst_17 = arith.constant dense<0.000000e+00> : vector<16x192xf32>
    %51 = tpu.matmul %13, %50, %cst_17 {dimension_numbers = #tpu.dot_dimension_numbers<[1], [0], [0], [1], [0, 0, 1, 1], [], []>} : vector<16x48xf32>, vector<48x192xf32>, vector<16x192xf32> -> vector<16x192xf32>
    %c0_18 = arith.constant 0 : index
    %c0_19 = arith.constant 0 : index
    %c0_20 = arith.constant 0 : index
    %52 = vector.load %arg6[%c0_18, %c0_19, %c0_20] : memref<2x16x192xf32, #tpu.memory_space<vmem>>, vector<1x16x192xf32>
    %53 = vector.shape_cast %52 : vector<1x16x192xf32> to vector<16x192xf32>
    %54 = vector.shape_cast %51 : vector<16x192xf32> to vector<1x16x192xf32>
    tpu.vector_store %arg6[%c0_18, %c0_19, %c0_20], %54 {strides = array<i32>} : memref<2x16x192xf32, #tpu.memory_space<vmem>>, vector<1x16x192xf32>,
    %c1 = arith.constant 1 : index
    %c0_21 = arith.constant 0 : index
    %c0_22 = arith.constant 0 : index
    %55 = vector.load %arg5[%c1, %c0_21, %c0_22] : memref<2x8x192xf32, #tpu.memory_space<vmem>>, vector<1x8x192xf32>
    %56 = vector.shape_cast %55 : vector<1x8x192xf32> to vector<8x192xf32>
    %57 = vector.extract_strided_slice %56 {offsets = [0, 0], sizes = [1, 192], strides = [1, 1]} : vector<8x192xf32> to vector<1x192xf32>
    %58 = arith.fptosi %57 : vector<1x192xf32> to vector<1x192xi32>
    %c24_i32 = arith.constant 24 : i32
    %59 = vector.broadcast %c24_i32 : i32 to vector<1x192xi32>
    %60 = arith.addi %58, %59 : vector<1x192xi32>
    %61 = vector.extract_strided_slice %56 {offsets = [1, 0], sizes = [1, 192], strides = [1, 1]} : vector<8x192xf32> to vector<1x192xf32>
    %62 = vector.extract_strided_slice %56 {offsets = [2, 0], sizes = [1, 192], strides = [1, 1]} : vector<8x192xf32> to vector<1x192xf32>
    %63 = vector.broadcast %60 : vector<1x192xi32> to vector<48x192xi32>
    %64 = arith.cmpi eq, %15, %63 : vector<48x192xi32>
    %cst_23 = arith.constant 1.000000e+00 : f32
    %65 = vector.broadcast %cst_23 : f32 to vector<1x192xf32>
    %66 = arith.subf %65, %61 : vector<1x192xf32>
    %cst_24 = arith.constant 0.000000e+00 : f32
    %67 = vector.shape_cast %66 : vector<1x192xf32> to vector<1x192xf32>
    %68 = vector.broadcast %67 : vector<1x192xf32> to vector<48x192xf32>
    %69 = vector.broadcast %cst_24 : f32 to vector<48x192xf32>
    %70 = arith.select %64, %68, %69 : vector<48x192xi1>, vector<48x192xf32>
    %c1_i32_25 = arith.constant 1 : i32
    %71 = vector.broadcast %c1_i32_25 : i32 to vector<1x192xi32>
    %72 = arith.addi %60, %71 : vector<1x192xi32>
    %73 = vector.broadcast %72 : vector<1x192xi32> to vector<48x192xi32>
    %74 = arith.cmpi eq, %15, %73 : vector<48x192xi32>
    %cst_26 = arith.constant 0.000000e+00 : f32
    %75 = vector.shape_cast %61 : vector<1x192xf32> to vector<1x192xf32>
    %76 = vector.broadcast %75 : vector<1x192xf32> to vector<48x192xf32>
    %77 = vector.broadcast %cst_26 : f32 to vector<48x192xf32>
    %78 = arith.select %74, %76, %77 : vector<48x192xi1>, vector<48x192xf32>
    %79 = arith.addf %70, %78 : vector<48x192xf32>
    %80 = vector.broadcast %62 : vector<1x192xf32> to vector<48x192xf32>
    %81 = arith.mulf %79, %80 : vector<48x192xf32>
    %c1_i32_27 = arith.constant 1 : i32
    %82 = arith.addi %14, %c1_i32_27 : i32
    %83 = arith.index_cast %82 : i32 to index
    %84 = memref.load %arg1[%83] : memref<4xi32, #tpu.memory_space<smem>>
    %c24_i32_28 = arith.constant 24 : i32
    %85 = arith.addi %84, %c24_i32_28 : i32
    %86 = vector.broadcast %85 : i32 to vector<48x192xi32>
    %87 = arith.cmpi slt, %15, %86 : vector<48x192xi32>
    %cst_29 = arith.constant 0.000000e+00 : f32
    %88 = vector.broadcast %cst_29 : f32 to vector<48x192xf32>
    %89 = arith.select %87, %81, %88 : vector<48x192xi1>, vector<48x192xf32>
    %cst_30 = arith.constant dense<0.000000e+00> : vector<16x192xf32>
    %90 = tpu.matmul %13, %89, %cst_30 {dimension_numbers = #tpu.dot_dimension_numbers<[1], [0], [0], [1], [0, 0, 1, 1], [], []>} : vector<16x48xf32>, vector<48x192xf32>, vector<16x192xf32> -> vector<16x192xf32>
    %c1_31 = arith.constant 1 : index
    %c0_32 = arith.constant 0 : index
    %c0_33 = arith.constant 0 : index
    %91 = vector.load %arg6[%c1_31, %c0_32, %c0_33] : memref<2x16x192xf32, #tpu.memory_space<vmem>>, vector<1x16x192xf32>
    %92 = vector.shape_cast %91 : vector<1x16x192xf32> to vector<16x192xf32>
    %93 = vector.shape_cast %90 : vector<16x192xf32> to vector<1x16x192xf32>
    tpu.vector_store %arg6[%c1_31, %c0_32, %c0_33], %93 {strides = array<i32>} : memref<2x16x192xf32, #tpu.memory_space<vmem>>, vector<1x16x192xf32>,
    return
  }
  func.func @transform_0(%arg0: i32, %arg1: memref<4xi32, #tpu.memory_space<smem>>) -> (i32, i32, i32) {
    %c0_i32 = arith.constant 0 : i32
    %c0_i32_0 = arith.constant 0 : i32
    %c0_i32_1 = arith.constant 0 : i32
    return %arg0, %c0_i32, %c0_i32_0 : i32, i32, i32
  }
  func.func @transform_1(%arg0: i32, %arg1: memref<4xi32, #tpu.memory_space<smem>>) -> (i32, i32) {
    %c0_i32 = arith.constant 0 : i32
    %c0_i32_0 = arith.constant 0 : i32
    %c0_i32_1 = arith.constant 0 : i32
    return %c0_i32, %c0_i32_0 : i32, i32
  }
  func.func @transform_2(%arg0: i32, %arg1: memref<4xi32, #tpu.memory_space<smem>>) -> (i32, i32) {
    %c0_i32 = arith.constant 0 : i32
    %c0_i32_0 = arith.constant 0 : i32
    %c0_i32_1 = arith.constant 0 : i32
    return %c0_i32, %c0_i32_0 : i32, i32
  }
  func.func @transform_3(%arg0: i32, %arg1: memref<4xi32, #tpu.memory_space<smem>>) -> (i32, i32, i32) {
    %c0_i32 = arith.constant 0 : i32
    %c0_i32_0 = arith.constant 0 : i32
    %c0_i32_1 = arith.constant 0 : i32
    return %arg0, %c0_i32, %c0_i32_0 : i32, i32, i32
  }
  func.func @transform_4(%arg0: i32, %arg1: memref<4xi32, #tpu.memory_space<smem>>) -> (i32, i32, i32) {
    %c0_i32 = arith.constant 0 : i32
    %c0_i32_0 = arith.constant 0 : i32
    %c0_i32_1 = arith.constant 0 : i32
    return %arg0, %c0_i32, %c0_i32_0 : i32, i32, i32
  }
}

</mosaic_0001>

<bundles_post_ra>
// kernel: tpu_custom_call.1
= control target key start
LH: loop header
LB: loop body
LE: loop exit
PB: predicated region body
PF: predicated region fallthrough
CT: control target
= control target key end

     0   :  { %s2411_s0 = inlined_call_operand.vmem [shape: s32[4], index: 0, kind: input, shape index: {}]   ;;  %s2412_s1 = inlined_call_operand.vmem [shape: bf16[2,128,48], index: 1, kind: input, shape index: {}]   ;;  %s2413_s2 = inlined_call_operand.vmem [shape: bf16[256,128], index: 2, kind: input, shape index: {}]   ;;  %s2414_s3 = inlined_call_operand.vmem [shape: f32[16,128], index: 3, kind: input, shape index: {}]   ;;  %s2415_s4 = inlined_call_operand.hbm [shape: f32[4,8,192], index: 4, kind: input, shape index: {}]   ;;  %s2416_s5 = inlined_call_operand.hbm [shape: f32[4,16,192], index: 5, kind: output, shape index: {}]  }
   0x1   :  { %s10_s20 = sshll.u32 %s2411_s0, 4  ;;  %s11_s20 = int_to_ptr.vmem [resolvable:$true] %s10_s20 }
   0x2   :  { %s1658_s21 = scalar_lea.vmem %s11_s20, 16  ;;  %p1663_p1 = scmp.lt.s32.totalorder %s11_s20, %s11_s20 }
   0x3   :  { %p1659_p0 = scmp.ne.s32.totalorder %s11_s20, %s1658_s21  ;;  %p1664_p2 = scmp.lt.s32.totalorder %s1658_s21, %s1658_s21 }
   0x5   :  { %p1665_p3 = por %p1664_p2, %p1663_p1 }
   0x7   :  { %p1666_p4 = pnand %p1665_p3, %p1659_p0 }
   0x9   :  { %1669 = shalt.err (!%p1666_p4)  }
   0xa   :  { %s1770_s22 = smov [#allocation3]  }
   0xb   :  { %13 = dma.vmem_to_smem %s11_s20, 16, %s1770_s22, [#allocation2] }
   0xc   :  { %1744 = dma.done.wait [#allocation2], 16 }
   0xd   :  { %1745 = vsyncadd [#allocation2], 4294967280 }
   0xe   :  { %15 = sfence }
   0xf   :  { %16 = vsyncpa [#allocation5], 0 }
  0x10   :  { %18 = vsyncpa [#allocation5 + $0x1], 0 }
  0x11   :  { %19 = vsyncpa [#allocation6], 0 }
  0x12   :  { %21 = vsyncpa [#allocation6 + $0x1], 0  ;;  %s1811_s23 = smov 0   ;;  %s1813_s0 = smov 0  }
  0x13   :  { %s1815_s24 = smov 0   ;;  %s1817_s25 = smov 0  }
  0x14 LB: > { %s1832_s26 = sadd.s32 4294967295, %s1768_s25   ;;  %s1295_s27 = sadd.s32 4294967294, %s1768_s25   ;;  %s1768_s25 = sphi %s1817_s25, %s2441_s25   ;;  %s1764_s24 = sphi %s1815_s24, %s2440_s24   ;;  %s1760_s0 = sphi %s1813_s0, %s2439_s0   ;;  %s1756_s23 = sphi %s1811_s23, %s2438_s23  }
  0x15   : > { %s1836_s28 = sadd.s32 1, %s1768_s25   ;;  %s102_s29 = sadd.s32 1, %s1764_s24 }
  0x16   : > { %s99_s30 = ssub.s32 %s1768_s25, %s1836_s28  ;;  %p109_p5 = scmp.ne.s32.totalorder %s1764_s24, %s1760_s0 }
  0x17   : > { %p100_p6 = scmp.eq.s32.totalorder %s99_s30, 0  ;;  %p110_p7 = scmp.eq.s32.totalorder %s1768_s25, 0 }
  0x18   : > { %p115_p8 = scmp.ne.s32.totalorder %s1760_s0, %s1756_s23  ;;  %p116_p9 = scmp.eq.s32.totalorder %s1832_s26, 0 }
  0x19   : > { %s1848_s6 = scalar_select %p100_p6, %s1764_s24, %s102_s29  }
  0x1a   : > { %p1850_p10 = por %p110_p7, %p109_p5  ;;  %p1854_p11 = por %p116_p9, %p115_p8 }
  0x1b   : > { %p139_p12 = scmp.eq.s32.totalorder %s1832_s26, 1  ;;  %p145_p13 = scmp.eq.s32.totalorder %s1295_s27, 1 }
  0x1c   : > { %p1590_p1 = scmp.lt.s32.totalorder %s1768_s25, 2  ;;  %s179_s11 = sand.u32 1, %s1764_s24  }
  0x1d   : > { %p1861_p2 = por %p139_p12, %p109_p5  ;;  %p1865_p3 = por %p145_p13, %p115_p8 }
  0x1e   : > { %s1373_s12 = sshll.u32 %s1768_s25, 9  ;;  %s1298_s13 = sshll.u32 %s179_s11, 5 }
  0x1f   : > { %s2420_s9 = scalar_select %p1861_p2, 1, 0 }
  0x20   : > { %s2421_s10 = scalar_select %p1865_p3, 1, 0 }
  0x21   : > { %s1874_s16 = scalar_lea.hbm %s2415_s4, %s1373_s12  ;;  %s183_s17 = scalar_lea.vmem [#allocation4], %s1298_s13 }
  0x22   : > { %s191_s18 = sshll.u32 %s183_s17, 4  ;;  %p1878_p4 = pnand %p1590_p1, %p1850_p10  ;;  %s1882_s18 = int_to_ptr.vmem [resolvable:$true] %s191_s18 }
  0x23   : > { %s1884_s20 = scalar_lea.sflag [#allocation5], %s179_s11  ;;  %s1670_s21 = scalar_lea.hbm %s1874_s16, 512 }
  0x24   : > { %p1671_p5 = scmp.ne.s32.totalorder %s1874_s16, %s1670_s21  ;;  %p1672_p6 = pneg %p1878_p4 }
  0x25   : > { %s1675_s29 = scalar_lea.hbm %s2415_s4, 1024  ;;  %p1676_p9 = scmp.lt.u32.totalorder %s1874_s16, %s2415_s4 }
  0x26   : > { %p1673_p7 = pnand %p1672_p6, %p1671_p5  ;;  %p1677_p10 = scmp.lt.u32.totalorder %s1675_s29, %s1670_s21 }
  0x27   : > { %p1679_p13 = scmp.lt.u32.totalorder %s1670_s21, %s1874_s16 }
  0x28   : > { %p1674_p8 = pneg %p1673_p7  ;;  %p1678_p12 = por %p1677_p10, %p1676_p9 }
  0x2a   : > { %p1680_p1 = por %p1679_p13, %p1678_p12 }
  0x2c   : > { %p1681_p0 = pnand %p1680_p1, %p1674_p8 }
  0x2e   : > { %1684 = shalt.err (!%p1681_p0)
}
  0x2f   : > { %s1685_s11 = scalar_lea.vmem %s1882_s18, 512  ;;  %s1771_s12 = smov [#allocation4]  }
  0x30   : > { %p1686_p5 = scmp.ne.s32.totalorder %s1882_s18, %s1685_s11  ;;  %s1690_s13 = sshll.u32 %s1771_s12, 4  ;;  %s1691_s13 = int_to_ptr.vmem [resolvable:$false] %s1690_s13 }
  0x31   : > { %s1692_s14 = scalar_lea.vmem %s1691_s13, 1024  ;;  %p1693_p2 = scmp.lt.s32.totalorder %s1882_s18, %s1691_s13 }
  0x32   : > { %p1688_p7 = pnand %p1686_p5, %p1672_p6  ;;  %p1694_p9 = scmp.lt.s32.totalorder %s1692_s14, %s1685_s11 }
  0x34   : > { %p1689_p3 = pneg %p1688_p7  ;;  %p1695_p10 = por %p1694_p9, %p1693_p2 }
  0x36   : > { %p1696_p12 = pnand %p1695_p10, %p1689_p3 }
  0x38   : > { %1699 = shalt.err (!%p1696_p12)
}
  0x39   : > { %s1772_s15 = smov 256   ;;  %s1773_s17 = smov 16  }
  0x3a   : > { %1585 = dma.hbm_to_vmem [thread:$0]  (!%p1878_p4), %s1874_s16, 512, %s1882_s18, %s1884_s20, %s1772_s15, %s1772_s15, %s1773_s17  }
  0x3b   : > { %p1302_p0 = scmp.ge.s32.totalorder %s1768_s25, 1  ;;  %p199_p6 = scmp.lt.s32.totalorder %s1768_s25, 3 }
  0x3d   : > { %p200_p8 = pnand %p1302_p0, %p199_p6 }
  0x3e   : > { %s1915_s21 = sand.u32 (!%p200_p8), 1, %s1760_s0  }
  0x3f   : > { %203 = sbr.rel (%p200_p8) target bundleno = 867 (0x363), region = 36  ;;  %s1303_s22 = sshll.u32 (!%p200_p8), %s1915_s21, 5 }
  0x40   : > { %s206_s27 = scalar_lea.sflag (!%p200_p8), [#allocation5], %s1915_s21  ;;  %s1919_s29 = scalar_lea.vmem (!%p200_p8), [#allocation4], %s1303_s22 }
  0x46   : > { %1747 = dma.done.wait (%p1854_p11), %s206_s27, 512  }
  0x47   : > { %1749 = vsyncadd (%p1854_p11), %s206_s27, 4294966784  ;;  %p239_p2 = scmp.lt.s32.totalorder %s1832_s26, 1  ;;  %v1638_v4 = vld [vmem:[%s2413_s2] sm:$0xff]   ;;  %v1639_v9 = vld [vmem:[%s2413_s2 + $0x8] sm:$0xff]   ;;  %s1331_s15 = sshll.u32 %s1832_s26, 1 }
  0x48   : > { %1435 = vmatprep.mubr.bf16.mxu0 %v1638_v4  ;;  %v1640_v10 = vld [vmem:[%s2413_s2 + $0x10] sm:$0xff]   ;;  %v1641_v11 = vld [vmem:[%s2413_s2 + $0x18] sm:$0xff]   ;;  %v1642_v12 = vld [vmem:[%s2413_s2 + $0x20] sm:$0xff]   ;;  %s859_s17 = sld [smem:[#allocation3 + %s1331_s15]]  ;;  %s1091_s22 = sadd.s32 1, %s1331_s15 }
  0x49   : > { %s240_s16 = scalar_select %p239_p2, %s1832_s26, 1  ;;  %v1643_v13 = vld [vmem:[%s2413_s2 + $0x28] sm:$0xff]   ;;  %v1644_v14 = vld [vmem:[%s2413_s2 + $0x30] sm:$0xff]   ;;  %v1645_v15 = vld [vmem:[%s2413_s2 + $0x38] sm:$0xff]  }
  0x4a   : > { %v1646_v16 = vld [vmem:[%s2413_s2 + $0x40] sm:$0xff]   ;;  %v1647_v17 = vld [vmem:[%s2413_s2 + $0x48] sm:$0xff]   ;;  %v1648_v18 = vld [vmem:[%s2413_s2 + $0x50] sm:$0xff]   ;;  %s2129_s27 = sld [smem:[#allocation3 + %s1091_s22]]  ;;  %s1376_s20 = sshll.u32 %s1832_s26, 10 }
  0x4b   : > { %s1374_s18 = sshll.u32 %s240_s16, 6  ;;  %v1649_v19 = vld [vmem:[%s2413_s2 + $0x58] sm:$0xff]   ;;  %v1650_v20 = vld [vmem:[%s2413_s2 + $0x60] sm:$0xff]   ;;  %v1651_v21 = vld [vmem:[%s2413_s2 + $0x68] sm:$0xff]   ;;  %s2366_s7 = scalar_lea.hbm %s2416_s5, %s1376_s20 }
  0x4c   : > { %s243_s30 = scalar_lea.vmem %s2412_s1, %s1374_s18  ;;  %v1652_v22 = vld [vmem:[%s2413_s2 + $0x70] sm:$0xff]   ;;  %v1653_v23 = vld [vmem:[%s2413_s2 + $0x78] sm:$0xff]   ;;  %v648_v24 = vld [vmem:[%s2414_s3] sm:$0xff]  ;;  %s1196_s26 = scalar_lea.sflag [#allocation6], %s1915_s21 }
  0x4d   : > { %v1630_v0 = vld [vmem:[%s243_s30] sm:$0xff]   ;;  %v1631_v1 = vld [vmem:[%s243_s30 + $0x8] sm:$0xff]   ;;  %v1632_v2 = vld [vmem:[%s243_s30 + $0x10] sm:$0xff]   ;;  %1499 = vmatprep.mubr.f32.mxu1 %v648_v24  ;;  %p2435_p3 = scmp.ne.s32.totalorder %s2420_s9, 0  ;;  %s1775_s12 = smov [#allocation7]  }
  0x4e   : > { %1419 = vmatprep.subr.bf16.mxu0 %v1630_v0  ;;  %v1633_v3 = vld [vmem:[%s243_s30 + $0x18] sm:$0xff]   ;;  %v1634_v5 = vld [vmem:[%s243_s30 + $0x20] sm:$0xff]   ;;  %v1635_v6 = vld [vmem:[%s243_s30 + $0x28] sm:$0xff]   ;;  %s1704_s13 = sshll.u32 %s1775_s12, 4  ;;  %s1705_s13 = int_to_ptr.vmem [resolvable:$false] %s1704_s13 }
  0x4f   : > { %1420 = vmatpush3.bf16.msra.mxu0 %v1630_v0  ;;  %v1636_v7 = vld [vmem:[%s243_s30 + $0x30] sm:$0xff]   ;;  %v1637_v8 = vld [vmem:[%s243_s30 + $0x38] sm:$0xff]   ;;  %s1706_s14 = scalar_lea.vmem %s1705_s13, 2048 }
  0x50   : > { %1421 = vmatprep.subr.bf16.mxu0 %v1631_v1  ;;  %s1093_s16 = sadd.s32 24, %s2129_s27 }
  0x53   : > { %1422 = vmatpush3.bf16.msra.mxu0 %v1631_v1 }
  0x54   : > { %1423 = vmatprep.subr.bf16.mxu0 %v1632_v2 }
  0x57   : > { %1424 = vmatpush3.bf16.msra.mxu0 %v1632_v2 }
  0x58   : > { %1425 = vmatprep.subr.bf16.mxu0 %v1633_v3 }
  0x5b   : > { %1426 = vmatpush3.bf16.msra.mxu0 %v1633_v3 }
  0x5c   : > { %1427 = vmatprep.subr.bf16.mxu0 %v1634_v5 }
  0x5f   : > { %1428 = vmatpush3.bf16.msra.mxu0 %v1634_v5 }
  0x60   : > { %1429 = vmatprep.subr.bf16.mxu0 %v1635_v6 }
  0x63   : > { %1430 = vmatpush3.bf16.msra.mxu0 %v1635_v6 }
  0x64   : > { %1431 = vmatprep.subr.bf16.mxu0 %v1636_v7 }
  0x67   : > { %1432 = vmatpush3.bf16.msra.mxu0 %v1636_v7 }
  0x68   : > { %1433 = vmatprep.subr.bf16.mxu0 %v1637_v8 }
  0x6b   : > { %1434 = vmatpush3.bf16.msra.mxu0 %v1637_v8 }
  0x6e   : > { %1436 = vmatmul.mubr.bf16.vlgmr.msra.gmra.mrb[0].mxu0 %v1639_v9 }
  0x6f   : > { %1439 = vmatprep.mubr.bf16.mxu0 %v1640_v10 }
  0x76   : > { %1440 = vmatmul.mubr.bf16.gmra.mrb[4].mxu0 %v1641_v11 }
  0x77   : > { %1443 = vmatprep.mubr.bf16.mxu0 %v1642_v12 }
  0x7e   : > { %1444 = vmatmul.mubr.bf16.gmra.mrb[8].mxu0 %v1643_v13 }
  0x7f   : > { %1447 = vmatprep.mubr.bf16.mxu0 %v1644_v14 }
  0x86   : > { %1448 = vmatmul.mubr.bf16.gmra.mrb[12].mxu0 %v1645_v15 }
  0x87   : > { %1451 = vmatprep.mubr.bf16.mxu0 %v1646_v16 }
  0x8e   : > { %1452 = vmatmul.mubr.bf16.gmra.mrb[16].mxu0 %v1647_v17 }
  0x8f   : > { %1455 = vmatprep.mubr.bf16.mxu0 %v1648_v18 }
  0x96   : > { %1456 = vmatmul.mubr.bf16.gmra.mrb[20].mxu0 %v1649_v19 }
  0x97   : > { %1459 = vmatprep.mubr.bf16.mxu0 %v1650_v20 }
  0x9e   : > { %1460 = vmatmul.mubr.bf16.gmra.mrb[24].mxu0 %v1651_v21 }
  0x9f   : > { %1463 = vmatprep.mubr.bf16.mxu0 %v1652_v22 }
  0xa6   : > { %1464 = vmatmul.mubr.bf16.gmra.mrb[28].mxu0 %v1653_v23 }
 0x141   : > { %v1437_v25 = vpop.f32.mrb[0].mxu0 }
 0x142   : > { %v473_v26 = vpop.f32.mrb[1].mxu0  ;;  %v602_v42 = vmul.f32 %v1437_v25, %v1437_v25 }
 0x143   : > { %v1438_v27 = vpop.f32.mrb[2].mxu0  ;;  %v600_v45 = vmul.f32 %v473_v26, %v473_v26 }
 0x144   : > { %v476_v28 = vpop.f32.mrb[3].mxu0  ;;  %v603_v48 = vmul.f32 %v1438_v27, %v1438_v27 }
 0x145   : > { %v601_v52 = vmul.f32 %v476_v28, %v476_v28 }
 0x149   : > { %v1441_v29 = vpop.f32.mrb[4].mxu0 }
 0x14a   : > { %v489_v30 = vpop.f32.mrb[5].mxu0  ;;  %v606_v60 = vmul.f32 %v1441_v29, %v1441_v29 }
 0x14b   : > { %v1442_v31 = vpop.f32.mrb[6].mxu0  ;;  %v604_v63 = vmul.f32 %v489_v30, %v489_v30 }
 0x14c   : > { %v492_v32 = vpop.f32.mrb[7].mxu0  ;;  %v607_v2 = vmul.f32 %v1442_v31, %v1442_v31 }
 0x14d   : > { %v605_v6 = vmul.f32 %v492_v32, %v492_v32 }
 0x151   : > { %v1445_v33 = vpop.f32.mrb[8].mxu0 }
 0x152   : > { %v505_v34 = vpop.f32.mrb[9].mxu0  ;;  %v610_v14 = vmul.f32 %v1445_v33, %v1445_v33 }
 0x153   : > { %v1446_v35 = vpop.f32.mrb[10].mxu0  ;;  %v608_v17 = vmul.f32 %v505_v34, %v505_v34 }
 0x154   : > { %v508_v36 = vpop.f32.mrb[11].mxu0  ;;  %v611_v20 = vmul.f32 %v1446_v35, %v1446_v35 }
 0x155   : > { %v609_v24 = vmul.f32 %v508_v36, %v508_v36 }
 0x159   : > { %v1981_v37 = vpop.f32.mrb[12].mxu0 }
 0x15a   : > { %v1983_v38 = vpop.f32.mrb[13].mxu0  ;;  %v614_v32 = vmul.f32 %v1981_v37, %v1981_v37 }
 0x15b   : > { %v1985_v39 = vpop.f32.mrb[14].mxu0  ;;  %v612_v35 = vmul.f32 %v1983_v38, %v1983_v38 }
 0x15c   : > { %v1987_v40 = vpop.f32.mrb[15].mxu0  ;;  %v615_v36 = vmul.f32 %v1985_v39, %v1985_v39  ;;  %v649_v39 = vld [vmem:[%s2414_s3 + $0x8] sm:$0xff] }
 0x161   : > { %v1453_v41 = vpop.f32.mrb[16].mxu0 }
 0x162   : > { %v618_v43 = vmul.f32 %v1453_v41, %v1453_v41  ;;  %v537_v44 = vpop.f32.mrb[17].mxu0 }
 0x163   : > { %v616_v46 = vmul.f32 %v537_v44, %v537_v44  ;;  %v1454_v47 = vpop.f32.mrb[18].mxu0 }
 0x164   : > { %v634_v49 = vadd.f32 %v618_v43, %v602_v42  ;;  %v619_v50 = vmul.f32 %v1454_v47, %v1454_v47  ;;  %v540_v51 = vpop.f32.mrb[19].mxu0 }
 0x165   : > { %v632_v53 = vadd.f32 %v616_v46, %v600_v45  ;;  %v617_v54 = vmul.f32 %v540_v51, %v540_v51  ;;  %v613_v46 = vmul.f32 %v1987_v40, %v1987_v40  ;;  %v740_v40 = vld [vmem:[%s1919_s29 + $0x8] sm:$0xff]  ;;  %v732_v51 = vlaneseq }
 0x166   : > { %v635_v55 = vadd.f32 %v619_v50, %v603_v48 }
 0x167   : > { %v633_v56 = vadd.f32 %v617_v54, %v601_v52  ;;  %v1572_v52 = vtrunc.f32 %v740_v40 }
 0x168   : > { %v1506_v57 = vpack.c.bf16 %v635_v55, %v634_v49  ;;  %v2002_v55 = vshrl.u32 %v732_v51, 7 }
 0x169   : > { %v1457_v58 = vpop.f32.mrb[20].mxu0  ;;  %v1502_v59 = vpack.c.bf16 %v633_v56, %v632_v53  ;;  %v739_v53 = vld [vmem:[%s1919_s29] sm:$0xff]  ;;  %v1573_v56 = vcvt.f32.s32 %v1572_v52 }
 0x16a   : > { %v622_v61 = vmul.f32 %v1457_v58, %v1457_v58  ;;  %v553_v62 = vpop.f32.mrb[21].mxu0  ;;  %v1570_v54 = vtrunc.f32 %v739_v53  ;;  %v2005_v58 = vsub.s32 0, %v2002_v55 }
 0x16b   : > { %v620_v0 = vmul.f32 %v553_v62, %v553_v62  ;;  %v1458_v1 = vpop.f32.mrb[22].mxu0  ;;  %1503 = vmatprep.subr.bf16.mxu1 %v1502_v59 }
 0x16c   : > { %v638_v3 = vadd.f32 %v622_v61, %v606_v60  ;;  %v623_v4 = vmul.f32 %v1458_v1, %v1458_v1  ;;  %v556_v5 = vpop.f32.mrb[23].mxu0  ;;  %1505 = vmatpush3.bf16.msra.mxu1 %v1502_v59  ;;  %v786_v59 = vadd.s32 1, %v1573_v56  ;;  %v764_v60 = vsub.f32 1.0, %v740_v40 }
 0x16d   : > { %v636_v7 = vadd.f32 %v620_v0, %v604_v63  ;;  %v621_v8 = vmul.f32 %v556_v5, %v556_v5  ;;  %1507 = vmatprep.subr.bf16.mxu1 %v1506_v57  ;;  %v2008_v61 = vsub.s32 1, %v2002_v55  ;;  %v2012_v63 = vadd.s32 8, %v2002_v55 }
 0x16e   : > { %v639_v9 = vadd.f32 %v623_v4, %v607_v2  ;;  %v2015_v0 = vrot.slane %v1573_v56, %v2005_v58  ;;  %v2018_v1 = vrot.slane %v786_v59, %v2005_v58  ;;  %v763_v2 = vsub.f32 1.0, %v739_v53 }
 0x16f   : > { %v637_v10 = vadd.f32 %v621_v8, %v605_v6  ;;  %v2024_v4 = vrot.slane %v740_v40, %v2008_v61 }
 0x170   : > { %1509 = vmatpush3.bf16.msra.mxu1 %v1506_v57  ;;  %v1514_v11 = vpack.c.bf16 %v639_v9, %v638_v3  ;;  %v1571_v57 = vcvt.f32.s32 %v1570_v54  ;;  %v2021_v3 = vrot.slane %v764_v60, %v2008_v61  ;;  %vm752_vm0 = vcmp.eq.s32.totalorder %v2002_v55, %v2015_v0 }
 0x171   : > { %v1461_v12 = vpop.f32.mrb[24].mxu0  ;;  %v1510_v13 = vpack.c.bf16 %v637_v10, %v636_v7  ;;  %vm754_vm1 = vcmp.eq.s32.totalorder %v2012_v63, %v2015_v0  ;;  %vm796_vm2 = vcmp.eq.s32.totalorder %v2002_v55, %v2018_v1  ;;  %vm798_vm3 = vcmp.eq.s32.totalorder %v2012_v63, %v2018_v1 }
 0x172   : > { %v626_v15 = vmul.f32 %v1461_v12, %v1461_v12  ;;  %v569_v16 = vpop.f32.mrb[25].mxu0  ;;  %v785_v62 = vadd.s32 1, %v1571_v57  ;;  %v2029_v5 = vrot.slane %v1571_v57, %v2005_v58  ;;  %v774_v7 = vsel %vm752_vm0, %v2021_v3, 0.0 }
 0x173   : > { %v624_v18 = vmul.f32 %v569_v16, %v569_v16  ;;  %v1462_v19 = vpop.f32.mrb[26].mxu0  ;;  %1511 = vmatprep.subr.bf16.mxu1 %v1510_v13  ;;  %v776_v8 = vsel %vm754_vm1, %v2021_v3, 0.0  ;;  %v816_v9 = vsel %vm796_vm2, %v2024_v4, 0.0  ;;  %v818_v10 = vsel %vm798_vm3, %v2024_v4, 0.0 }
 0x174   : > { %v642_v21 = vadd.f32 %v626_v15, %v610_v14  ;;  %v627_v22 = vmul.f32 %v1462_v19, %v1462_v19  ;;  %v572_v23 = vpop.f32.mrb[27].mxu0  ;;  %1513 = vmatpush3.bf16.msra.mxu1 %v1510_v13  ;;  %v2032_v6 = vrot.slane %v785_v62, %v2005_v58  ;;  %v830_v12 = vadd.f32 %v818_v10, %v776_v8 }
 0x175   : > { %v640_v25 = vadd.f32 %v624_v18, %v608_v17  ;;  %v625_v26 = vmul.f32 %v572_v23, %v572_v23  ;;  %1515 = vmatprep.subr.bf16.mxu1 %v1514_v11  ;;  %v2047_v13 = vsub.s32 2, %v2002_v55  ;;  %vm751_vm4 = vcmp.eq.s32.totalorder %v2002_v55, %v2029_v5 }
 0x176   : > { %v643_v27 = vadd.f32 %v627_v22, %v611_v20  ;;  %vm753_vm5 = vcmp.eq.s32.totalorder %v2012_v63, %v2029_v5  ;;  %v2054_v14 = vrot.slane %v763_v2, %v2008_v61  ;;  %vm795_vm6 = vcmp.eq.s32.totalorder %v2002_v55, %v2032_v6 }
 0x177   : > { %v641_v28 = vadd.f32 %v625_v26, %v609_v24  ;;  %vm797_vm7 = vcmp.eq.s32.totalorder %v2012_v63, %v2032_v6  ;;  %v2061_v15 = vrot.slane %v740_v40, %v2047_v13  ;;  %v2064_v16 = vrot.slane %v739_v53, %v2008_v61 }
 0x178   : > { %1517 = vmatpush3.bf16.msra.mxu1 %v1514_v11  ;;  %v1522_v29 = vpack.c.bf16 %v643_v27, %v642_v21  ;;  %v828_v11 = vadd.f32 %v816_v9, %v774_v7  ;;  %v2067_v17 = vrot.slane %v739_v53, %v2047_v13  ;;  %v2070_v18 = vadd.s32 16, %v2002_v55 }
 0x179   : > { %v1465_v30 = vpop.f32.mrb[28].mxu0  ;;  %v1518_v31 = vpack.c.bf16 %v641_v28, %v640_v25  ;;  %v2072_v19 = vstv %s859_s17  ;;  %v773_v20 = vsel %vm751_vm4, %v2054_v14, 0.0  ;;  %v775_v21 = vsel %vm753_vm5, %v2054_v14, 0.0 }
 0x17a   : > { %v630_v33 = vmul.f32 %v1465_v30, %v1465_v30  ;;  %v585_v34 = vpop.f32.mrb[29].mxu0  ;;  %v2077_v22 = vadd.s32 24, %v2002_v55  ;;  %v848_v23 = vmul.f32 %v2061_v15, %v828_v11  ;;  %v850_v24 = vmul.f32 %v2061_v15, %v830_v12 }
 0x17b   : > { %v628_v41 = vmul.f32 %v585_v34, %v585_v34  ;;  %v1466_v42 = vpop.f32.mrb[30].mxu0  ;;  %1519 = vmatprep.subr.bf16.mxu1 %v1518_v31  ;;  %vm861_vm8 = vcmp.lt.s32.totalorder %v2002_v55, %v2072_v19  ;;  %vm862_vm9 = vcmp.lt.s32.totalorder %v2012_v63, %v2072_v19  ;;  %v815_v26 = vsel %vm795_vm6, %v2064_v16, 0.0 }
 0x17c   : > { %v646_v43 = vadd.f32 %v630_v33, %v614_v32  ;;  %v631_v44 = vmul.f32 %v1466_v42, %v1466_v42  ;;  %v588_v45 = vpop.f32.mrb[31].mxu0  ;;  %1521 = vmatpush3.bf16.msra.mxu1 %v1518_v31  ;;  %vm2085_vm10 = vmpackc.low %vm862_vm9, %vm861_vm8  ;;  %v817_v27 = vsel %vm797_vm7, %v2064_v16, 0.0  ;;  %vm756_vm11 = vcmp.eq.s32.totalorder %v2070_v18, %v2015_v0 }
 0x17d   : > { %v644_v37 = vadd.f32 %v628_v41, %v612_v35  ;;  %v629_v47 = vmul.f32 %v588_v45, %v588_v45  ;;  %1523 = vmatprep.subr.bf16.mxu1 %v1522_v29  ;;  %vm758_vm12 = vcmp.eq.s32.totalorder %v2077_v22, %v2015_v0  ;;  %v1534_v28 = vpack.c.bf16 %v850_v24, %v848_v23  ;;  %v1347_v45 = vld [vmem:[%s1919_s29 + $0x18] sm:$0xff] }
 0x17e   : > { %v647_v48 = vadd.f32 %v631_v44, %v615_v36  ;;  %v829_v30 = vadd.f32 %v817_v27, %v775_v21  ;;  %v778_v31 = vsel %vm756_vm11, %v2021_v3, 0.0  ;;  %v780_v32 = vsel %vm758_vm12, %v2021_v3, 0.0  ;;  %v1346_v21 = vld [vmem:[%s1919_s29 + $0x10] sm:$0xff]  ;;  %s1304_s29 = sshll.u32 %s1915_s21, 6 }
 0x17f   : > { %v645_v38 = vadd.f32 %v629_v47, %v613_v46  ;;  %vm800_vm13 = vcmp.eq.s32.totalorder %v2070_v18, %v2018_v1  ;;  %vm802_vm14 = vcmp.eq.s32.totalorder %v2077_v22, %v2018_v1  ;;  %vm755_vm15 = vcmp.eq.s32.totalorder %v2070_v18, %v2029_v5  ;;  %s238_s18 = scalar_lea.vmem [#allocation7], %s1304_s29 }
 0x180   : > { %1525 = vmatpush3.bf16.msra.mxu1 %v1522_v29  ;;  %v1530_v49 = vpack.c.bf16 %v647_v48, %v646_v43  ;;  %v827_v29 = vadd.f32 %v815_v26, %v773_v20  ;;  %v849_v34 = vmul.f32 %v2067_v17, %v829_v30  ;;  %v820_v35 = vsel %vm800_vm13, %v2024_v4, 0.0  ;;  %s1210_s19 = sshll.u32 %s238_s18, 4  ;;  %s2360_s19 = int_to_ptr.vmem [resolvable:$true] %s1210_s19 }
 0x181   : > { %v1526_v50 = vpack.c.bf16 %v645_v38, %v644_v37  ;;  %v822_v41 = vsel %vm802_vm14, %v2024_v4, 0.0  ;;  %v832_v42 = vadd.f32 %v820_v35, %v778_v31  ;;  %vm863_vm0 = vcmp.lt.s32.totalorder %v2070_v18, %v2072_v19  ;;  %s1700_s11 = scalar_lea.vmem %s2360_s19, 1024  ;;  %p1707_p1 = scmp.lt.s32.totalorder %s2360_s19, %s1705_s13 }
 0x182   : > { %v847_v33 = vmul.f32 %v2067_v17, %v827_v29  ;;  %v834_v36 = vadd.f32 %v822_v41, %v780_v32  ;;  %vm864_vm1 = vcmp.lt.s32.totalorder %v2077_v22, %v2072_v19  ;;  %vm757_vm2 = vcmp.eq.s32.totalorder %v2077_v22, %v2029_v5  ;;  %p1701_p11 = scmp.ne.s32.totalorder %s2360_s19, %s1700_s11  ;;  %p1708_p5 = scmp.lt.s32.totalorder %s1706_s14, %s1700_s11 }
 0x183   : > { %1527 = vmatprep.subr.bf16.mxu1 %v1526_v50  ;;  %v777_v44 = vsel %vm755_vm15, %v2054_v14, 0.0  ;;  %vm799_vm3 = vcmp.eq.s32.totalorder %v2070_v18, %v2032_v6  ;;  %v852_v46 = vmul.f32 %v2061_v15, %v832_v42  ;;  %v779_v47 = vsel %vm757_vm2, %v2054_v14, 0.0  ;;  %vm2133_vm5 = vmpackc.low %vm864_vm1, %vm863_vm0 }
 0x184   : > { %1529 = vmatpush3.bf16.msra.mxu1 %v1526_v50  ;;  %v1537_v43 = vpack.c.bf16 %v849_v34, %v847_v33  ;;  %v854_v37 = vmul.f32 %v2061_v15, %v834_v36  ;;  %vm801_vm4 = vcmp.eq.s32.totalorder %v2077_v22, %v2032_v6  ;;  %v819_v38 = vsel %vm799_vm3, %v2064_v16, 0.0  ;;  %p1702_p4 = pnand %p1701_p11, %p2435_p3  ;;  %p1709_p7 = por %p1708_p5, %p1707_p1 }
 0x185   : > { %1531 = vmatprep.subr.bf16.mxu1 %v1530_v49  ;;  %v2140_v50 = vadd.s32 32, %v2002_v55  ;;  %v831_v51 = vadd.f32 %v819_v38, %v777_v44  ;;  %v1576_v53 = vtrunc.f32 %v1347_v45  ;;  %v996_v20 = vsub.f32 1.0, %v1347_v45 }
 0x186   : > { %v1540_v40 = vpack.c.bf16 %v854_v37, %v852_v46  ;;  %v2198_v25 = vstv %s1093_s16  ;;  %v2207_v27 = vrot.slane %v1347_v45, %v2047_v13  ;;  %v1574_v30 = vtrunc.f32 %v1346_v21  ;;  %p1703_p13 = pneg %p1702_p4 }
 0x187   : > { %vm760_vm6 = vcmp.eq.s32.totalorder %v2140_v50, %v2015_v0  ;;  %vm804_vm8 = vcmp.eq.s32.totalorder %v2140_v50, %v2018_v1  ;;  %v851_v54 = vmul.f32 %v2067_v17, %v831_v51  ;;  %vm759_vm12 = vcmp.eq.s32.totalorder %v2140_v50, %v2029_v5 }
 0x188   : > { %1533 = vmatpush3.bf16.msra.mxu1 %v1530_v49  ;;  %v821_v49 = vsel %vm801_vm4, %v2064_v16, 0.0  ;;  %v782_v57 = vsel %vm760_vm6, %v2021_v3, 0.0  ;;  %v824_v60 = vsel %vm804_vm8, %v2024_v4, 0.0  ;;  %vm803_vm14 = vcmp.eq.s32.totalorder %v2140_v50, %v2032_v6  ;;  %p1710_p9 = pnand %p1709_p7, %p1703_p13 }
 0x189   : > { %1536 = vmatprep.subr.msk.bf16.mxu1 %vm2085_vm10, %v1534_v28  ;;  %v833_v52 = vadd.f32 %v821_v49, %v779_v47  ;;  %v1577_v11 = vcvt.f32.s32 %v1576_v53  ;;  %v2204_v26 = vrot.slane %v996_v20, %v2008_v61  ;;  %vm1095_vm1 = vcmp.lt.s32.totalorder %v2002_v55, %v2198_v25 }
 0x18a   : > { %vm1096_vm2 = vcmp.lt.s32.totalorder %v2012_v63, %v2198_v25  ;;  %v995_v32 = vsub.f32 1.0, %v1346_v21  ;;  %v2220_v33 = vrot.slane %v1346_v21, %v2047_v13  ;;  %v1575_v35 = vcvt.f32.s32 %v1574_v30 }
 0x18b   : > { %1500 = vmatmul.mubr.f32.vlgmr.msra.gmra.mrb[0].mxu1 %v649_v39  ;;  %v2143_v39 = vadd.s32 40, %v2002_v55  ;;  %v853_v56 = vmul.f32 %v2067_v17, %v833_v52  ;;  %v974_v24 = vadd.s32 24, %v1577_v11 }
 0x18c   : > { %1539 = vmatpush1.bf16.msk.msra.mxu1 %vm2085_vm10, %v1537_v43  ;;  %vm865_vm10 = vcmp.lt.s32.totalorder %v2140_v50, %v2072_v19  ;;  %v2234_v13 = vrot.slane %v995_v32, %v2008_v61  ;;  %v973_v36 = vadd.s32 24, %v1575_v35 }
 0x18d   : > { %vm762_vm7 = vcmp.eq.s32.totalorder %v2143_v39, %v2015_v0  ;;  %vm806_vm9 = vcmp.eq.s32.totalorder %v2143_v39, %v2018_v1  ;;  %1542 = vmatprep.subr.msk.bf16.mxu1 %vm2133_vm5, %v1540_v40  ;;  %vm866_vm11 = vcmp.lt.s32.totalorder %v2143_v39, %v2072_v19  ;;  %v1543_v0 = vpack.c.bf16 %v853_v56, %v851_v54 }
 0x18e   : > { %v784_v59 = vsel %vm762_vm7, %v2021_v3, 0.0  ;;  %v826_v62 = vsel %vm806_vm9, %v2024_v4, 0.0  ;;  %v836_v1 = vadd.f32 %v824_v60, %v782_v57  ;;  %vm761_vm13 = vcmp.eq.s32.totalorder %v2143_v39, %v2029_v5  ;;  %vm2187_vm0 = vmpackc.low %vm866_vm11, %vm865_vm10 }
 0x18f   : > { %v838_v2 = vadd.f32 %v826_v62, %v784_v59  ;;  %v781_v3 = vsel %vm759_vm12, %v2054_v14, 0.0  ;;  %vm805_vm15 = vcmp.eq.s32.totalorder %v2143_v39, %v2032_v6  ;;  %v783_v8 = vsel %vm761_vm13, %v2054_v14, 0.0 }
 0x190   : > { %1545 = vmatpush1.bf16.msk.msra.mxu1 %vm2133_vm5, %v1543_v0  ;;  %v856_v4 = vmul.f32 %v2061_v15, %v836_v1  ;;  %v823_v5 = vsel %vm803_vm14, %v2064_v16, 0.0  ;;  %v825_v9 = vsel %vm805_vm15, %v2064_v16, 0.0  ;;  %v1774_v14 = vmov 0.0  }
 0x191   : > { %v858_v7 = vmul.f32 %v2061_v15, %v838_v2  ;;  %v835_v10 = vadd.f32 %v823_v5, %v781_v3  ;;  %v837_v15 = vadd.f32 %v825_v9, %v783_v8  ;;  %950 = vmatprep.mubr.f32.mxu1 %v1774_v14  ;;  %v2196_v19 = vrot.slane %v1347_v45, %v2008_v61 }
 0x192   : > { %v2212_v28 = vrot.slane %v974_v24, %v2005_v58  ;;  %v1018_v29 = vadd.s32 1, %v974_v24  ;;  %v2249_v47 = vrot.slane %v973_v36, %v2005_v58  ;;  %v1017_v48 = vadd.s32 1, %v973_v36 }
 0x193   : > { %v1546_v12 = vpack.c.bf16 %v858_v7, %v856_v4  ;;  %v855_v23 = vmul.f32 %v2067_v17, %v835_v10  ;;  %v857_v16 = vmul.f32 %v2067_v17, %v837_v15  ;;  %v2217_v17 = vrot.slane %v1346_v21, %v2008_v61 }
 0x194   : > { %vm984_vm3 = vcmp.eq.s32.totalorder %v2002_v55, %v2212_v28  ;;  %vm986_vm4 = vcmp.eq.s32.totalorder %v2012_v63, %v2212_v28  ;;  %v2227_v34 = vrot.slane %v1018_v29, %v2005_v58  ;;  %vm988_vm5 = vcmp.eq.s32.totalorder %v2070_v18, %v2212_v28 }
 0x195   : > { %1548 = vmatprep.subr.msk.bf16.mxu1 %vm2187_vm0, %v1546_v12  ;;  %v1549_v31 = vpack.c.bf16 %v857_v16, %v855_v23  ;;  %v1006_v41 = vsel %vm984_vm3, %v2204_v26, 0.0  ;;  %v1008_v42 = vsel %vm986_vm4, %v2204_v26, 0.0  ;;  %vm990_vm8 = vcmp.eq.s32.totalorder %v2077_v22, %v2212_v28 }
 0x196   : > { %vm1028_vm6 = vcmp.eq.s32.totalorder %v2002_v55, %v2227_v34  ;;  %vm1030_vm7 = vcmp.eq.s32.totalorder %v2012_v63, %v2227_v34  ;;  %v1010_v61 = vsel %vm988_vm5, %v2204_v26, 0.0  ;;  %v1012_v45 = vsel %vm990_vm8, %v2204_v26, 0.0 }
 0x197   : > { %1551 = vmatpush1.bf16.msk.msra.mxu1 %vm2187_vm0, %v1549_v31  ;;  %v1048_v43 = vsel %vm1028_vm6, %v2196_v19, 0.0  ;;  %v1050_v44 = vsel %vm1030_vm7, %v2196_v19, 0.0  ;;  %vm1032_vm9 = vcmp.eq.s32.totalorder %v2070_v18, %v2227_v34  ;;  %vm1034_vm10 = vcmp.eq.s32.totalorder %v2077_v22, %v2227_v34  ;;  %vm2275_vm0 = vmpackc.low %vm1096_vm2, %vm1095_vm1 }
 0x198   : > { %v1060_v46 = vadd.f32 %v1048_v43, %v1006_v41  ;;  %v1062_v37 = vadd.f32 %v1050_v44, %v1008_v42  ;;  %vm1097_vm11 = vcmp.lt.s32.totalorder %v2070_v18, %v2198_v25  ;;  %vm1098_vm12 = vcmp.lt.s32.totalorder %v2077_v22, %v2198_v25 }
 0x199   : > { %vm983_vm13 = vcmp.eq.s32.totalorder %v2002_v55, %v2249_v47  ;;  %vm985_vm14 = vcmp.eq.s32.totalorder %v2012_v63, %v2249_v47  ;;  %vm2265_vm15 = vmpackc.low %vm1098_vm12, %vm1097_vm11  ;;  %v1022_v54 = vrot.slane %v1017_v48, %v2005_v58  ;;  %v1052_v56 = vsel %vm1032_vm9, %v2196_v19, 0.0 }
 0x19a   : > { %v1080_v38 = vmul.f32 %v2207_v27, %v1060_v46  ;;  %v1082_v49 = vmul.f32 %v2207_v27, %v1062_v37  ;;  %v1005_v52 = vsel %vm983_vm13, %v2234_v13, 0.0  ;;  %v1007_v53 = vsel %vm985_vm14, %v2234_v13, 0.0 }
 0x19b   : > { %v1054_v59 = vsel %vm1034_vm10, %v2196_v19, 0.0  ;;  %v1064_v60 = vadd.f32 %v1052_v56, %v1010_v61  ;;  %vm987_vm3 = vcmp.eq.s32.totalorder %v2070_v18, %v2249_v47  ;;  %vm1027_vm1 = vcmp.eq.s32.totalorder %v2002_v55, %v1022_v54 }
 0x19c   : > { %v1552_v57 = vpack.c.bf16 %v1082_v49, %v1080_v38  ;;  %vm1029_vm2 = vcmp.eq.s32.totalorder %v2012_v63, %v1022_v54  ;;  %v1066_v62 = vadd.f32 %v1054_v59, %v1012_v45  ;;  %vm989_vm4 = vcmp.eq.s32.totalorder %v2077_v22, %v2249_v47 }
 0x19d   : > { %v1047_v58 = vsel %vm1027_vm1, %v2217_v17, 0.0  ;;  %v1049_v0 = vsel %vm1029_vm2, %v2217_v17, 0.0  ;;  %v2295_v1 = vmul.f32 %v2207_v27, %v1064_v60  ;;  %v1009_v2 = vsel %vm987_vm3, %v2234_v13, 0.0 }
 0x19e   : > { %1554 = vmatprep.subr.msk.bf16.mxu1 %vm2275_vm0, %v1552_v57  ;;  %v1059_v3 = vadd.f32 %v1047_v58, %v1005_v52  ;;  %v1061_v55 = vadd.f32 %v1049_v0, %v1007_v53  ;;  %v1086_v63 = vmul.f32 %v2207_v27, %v1066_v62  ;;  %v1011_v4 = vsel %vm989_vm4, %v2234_v13, 0.0 }
 0x19f   : > { %vm1031_vm5 = vcmp.eq.s32.totalorder %v2070_v18, %v1022_v54  ;;  %vm1033_vm6 = vcmp.eq.s32.totalorder %v2077_v22, %v1022_v54  ;;  %vm992_vm7 = vcmp.eq.s32.totalorder %v2140_v50, %v2212_v28  ;;  %vm994_vm8 = vcmp.eq.s32.totalorder %v2143_v39, %v2212_v28 }
 0x1a0   : > { %v1079_v7 = vmul.f32 %v2220_v33, %v1059_v3  ;;  %v1081_v8 = vmul.f32 %v2220_v33, %v1061_v55  ;;  %v1558_v5 = vpack.c.bf16 %v1086_v63, %v2295_v1  ;;  %v1051_v6 = vsel %vm1031_vm5, %v2217_v17, 0.0 }
 0x1a1   : > { %v1053_v9 = vsel %vm1033_vm6, %v2217_v17, 0.0  ;;  %v1063_v10 = vadd.f32 %v1051_v6, %v1009_v2  ;;  %v1014_v18 = vsel %vm992_vm7, %v2204_v26, 0.0  ;;  %v1016_v22 = vsel %vm994_vm8, %v2204_v26, 0.0 }
 0x1a2   : > { %v1555_v11 = vpack.c.bf16 %v1081_v8, %v1079_v7  ;;  %v1065_v12 = vadd.f32 %v1053_v9, %v1011_v4  ;;  %vm1036_vm9 = vcmp.eq.s32.totalorder %v2140_v50, %v2227_v34  ;;  %vm1038_vm10 = vcmp.eq.s32.totalorder %v2143_v39, %v2227_v34 }
 0x1a3   : > { %v1083_v15 = vmul.f32 %v2220_v33, %v1063_v10  ;;  %v1056_v20 = vsel %vm1036_vm9, %v2196_v19, 0.0  ;;  %v1058_v21 = vsel %vm1038_vm10, %v2196_v19, 0.0  ;;  %vm1099_vm11 = vcmp.lt.s32.totalorder %v2140_v50, %v2198_v25 }
 0x1a4   : > { %v1085_v23 = vmul.f32 %v2220_v33, %v1065_v12  ;;  %v1068_v24 = vadd.f32 %v1056_v20, %v1014_v18  ;;  %v1070_v16 = vadd.f32 %v1058_v21, %v1016_v22  ;;  %vm1100_vm12 = vcmp.lt.s32.totalorder %v2143_v39, %v2198_v25 }
 0x1a5   : > { %vm2325_vm13 = vmpackc.low %vm1100_vm12, %vm1099_vm11  ;;  %vm991_vm14 = vcmp.eq.s32.totalorder %v2140_v50, %v2249_v47  ;;  %vm993_vm3 = vcmp.eq.s32.totalorder %v2143_v39, %v2249_v47  ;;  %vm1035_vm1 = vcmp.eq.s32.totalorder %v2140_v50, %v1022_v54  ;;  %vm1037_vm2 = vcmp.eq.s32.totalorder %v2143_v39, %v1022_v54 }
 0x1a6   : > { %v1561_v19 = vpack.c.bf16 %v1085_v23, %v1083_v15  ;;  %v1088_v28 = vmul.f32 %v2207_v27, %v1068_v24  ;;  %v1090_v29 = vmul.f32 %v2207_v27, %v1070_v16  ;;  %v1013_v25 = vsel %vm991_vm14, %v2234_v13, 0.0 }
 0x1a7   : > { %v1015_v30 = vsel %vm993_vm3, %v2234_v13, 0.0  ;;  %v1055_v31 = vsel %vm1035_vm1, %v2217_v17, 0.0  ;;  %v1057_v32 = vsel %vm1037_vm2, %v2217_v17, 0.0  ;;  %vm879_vm4 = vcmask 392192  }
 0x1a8   : > { %v1564_v34 = vpack.c.bf16 %v1090_v29, %v1088_v28  ;;  %v1067_v35 = vadd.f32 %v1055_v31, %v1013_v25  ;;  %v1069_v41 = vadd.f32 %v1057_v32, %v1015_v30 }
 0x1aa   : > { %v1087_v50 = vmul.f32 %v2220_v33, %v1067_v35  ;;  %v1089_v39 = vmul.f32 %v2220_v33, %v1069_v41 }
 0x1ac   : > { %v1567_v42 = vpack.c.bf16 %v1089_v39, %v1087_v50 }
 0x25e   : > { %v1501_v36 = vpop.f32.mrb[0].mxu1 }
 0x25f   : > { %v716_v43 = vpop.f32.mrb[1].mxu1  ;;  %v726_v44 = vmax.f32 %v1501_v36, 1e-10 }
 0x260   : > { %v725_v27 = vmax.f32 %v716_v43, 1e-10 }
 0x262   : > { %1654 = vlog2.f32 %v725_v27 }
 0x263   : > { %1656 = vlog2.f32 %v726_v44 }
 0x26c   : > { %v1655_v61 = vpop.eup %1654 }
 0x26d   : > { %v728_v13 = vmul.f32 0.6931472, %v1655_v61  ;;  %v1657_v45 = vpop.eup %1656 }
 0x26e   : > { %v730_v17 = vmul.f32 0.6931472, %v1657_v45 }
 0x26f   : > { %1344 = vmatmul.mubr.msk.f32.vlgmr.msra.gmra.mrb[2].mxu1 %vm879_vm4, %v728_v13 }
 0x270   : > { %1557 = vmatpush1.bf16.msk.msra.mxu1 %vm2275_vm0, %v1555_v11  ;;  %956 = vmatprep.mubr.f32.mxu1 %v1774_v14  ;;  %vm964_vm0 = vcmask 523264  }
 0x271   : > { %1560 = vmatprep.subr.msk.bf16.mxu1 %vm2265_vm15, %v1558_v5 }
 0x273   : > { %1345 = vmatmul.mubr.msk.f32.gmra.mrb[4].mxu1 %vm879_vm4, %v730_v17 }
 0x274   : > { %1563 = vmatpush1.bf16.msk.msra.mxu1 %vm2265_vm15, %v1561_v19  ;;  %1177 = vmatprep.mubr.f32.mxu1 %v1774_v14 }
 0x275   : > { %1566 = vmatprep.subr.msk.bf16.mxu1 %vm2325_vm13, %v1564_v34 }
 0x278   : > { %1569 = vmatpush1.bf16.msk.msra.mxu1 %vm2325_vm13, %v1567_v42 }
 0x27b   : > { %1360 = vmatmul.mubr.msk.f32.vlgmr.msra.gmra.mrb[6].mxu1 %vm879_vm4, %v728_v13 }
 0x27c   : > { %1183 = vmatprep.mubr.f32.mxu1 %v1774_v14 }
 0x27f   : > { %1361 = vmatmul.mubr.msk.f32.gmra.mrb[8].mxu1 %vm879_vm4, %v730_v17 }
 0x342   : > { %v952_v33 = vpop.f32.mrb[2].mxu1 }
 0x343   : > { %963 = vst [vmem:[%s238_s18] sm:$0xff] %v952_v33  ;;  %v954_v46 = vpop.f32.mrb[3].mxu1 }
 0x344   : > { %965 = vst.msk [vmem:[%s238_s18 + $0x8] sm:$0xff] %vm964_vm0, %v954_v46 }
 0x346   : > { %v958_v37 = vpop.f32.mrb[4].mxu1 }
 0x347   : > { %966 = vst [vmem:[%s238_s18 + $0x10] sm:$0xff] %v958_v37  ;;  %v960_v47 = vpop.f32.mrb[5].mxu1 }
 0x348   : > { %967 = vst.msk [vmem:[%s238_s18 + $0x18] sm:$0xff] %vm964_vm0, %v960_v47 }
 0x34e   : > { %v1179_v48 = vpop.f32.mrb[6].mxu1 }
 0x34f   : > { %1362 = vst [vmem:[%s238_s18 + $0x20] sm:$0xff] %v1179_v48  ;;  %v1181_v14 = vpop.f32.mrb[7].mxu1 }
 0x350   : > { %1363 = vst.msk [vmem:[%s238_s18 + $0x28] sm:$0xff] %vm964_vm0, %v1181_v14 }
 0x352   : > { %v1185_v38 = vpop.f32.mrb[8].mxu1 }
 0x353   : > { %1364 = vst [vmem:[%s238_s18 + $0x30] sm:$0xff] %v1185_v38  ;;  %v1187_v49 = vpop.f32.mrb[9].mxu1 }
 0x354   : > { %1365 = vst.msk [vmem:[%s238_s18 + $0x38] sm:$0xff] %vm964_vm0, %v1187_v49 }
 0x355   : > { %1713 = shalt.err (!%p1710_p9)
}
 0x356   : > { %s1714_s15 = scalar_lea.hbm %s2366_s7, 1024  ;;  %s1718_s27 = scalar_lea.hbm %s2416_s5, 2048 }
 0x357   : > { %p1715_p10 = scmp.ne.s32.totalorder %s2366_s7, %s1714_s15  ;;  %p1719_p6 = scmp.lt.u32.totalorder %s2366_s7, %s2416_s5 }
 0x358   : > { %p1720_p8 = scmp.lt.u32.totalorder %s1718_s27, %s1714_s15  ;;  %p1722_p11 = scmp.lt.u32.totalorder %s1714_s15, %s2366_s7 }
 0x359   : > { %p1716_p12 = pnand %p1715_p10, %p2435_p3 }
 0x35a   : > { %p1721_p2 = por %p1720_p8, %p1719_p6 }
 0x35b   : > { %p1717_p0 = pneg %p1716_p12 }
 0x35c   : > { %p1723_p4 = por %p1722_p11, %p1721_p2 }
 0x35e   : > { %p1724_p13 = pnand %p1723_p4, %p1717_p0 }
 0x360   : > { %1727 = shalt.err (!%p1724_p13)
}
 0x361   : > { %s1776_s18 = smov 256   ;;  %s1777_s20 = smov 16  }
 0x362   : > { %1580 = dma.vmem_to_hbm [thread:$0]  (%p2435_p3), %s2360_s19, 1024, %s2366_s7, %s1196_s26, %s1776_s18, %s1776_s18, %s1777_s20  }
 0x363 PF: > { %s1225_s30 = sand.u32 1, %s1756_s23   ;;  %p2436_p1 = scmp.ne.s32.totalorder %s2421_s10, 0 }
 0x364   : > { %p2437_p5 = scmp.ge.s32.totalorder %s1768_s25, 2  ;;  %s1226_s8 = scalar_lea.sflag [#allocation6], %s1225_s30 }
 0x366   : > { %p1587_p7 = pnand %p2437_p5, %p2436_p1 }
 0x368   : > { %1751 = dma.done.wait (!%p1587_p7), %s1226_s8, 1024  }
 0x369   : > { %1753 = vsyncadd (!%p1587_p7), %s1226_s8, 4294966272  ;;  %p24_p9 = scmp.ge.s32.totalorder %s1836_s28, 4   ;;  %s2438_s23 = smov %s1760_s0 }
 0x36a   : > { %s2439_s0 = smov %s1764_s24  ;;  %s2440_s24 = smov %s1848_s6 }
 0x36b   : > { %s2441_s25 = smov %s1836_s28  ;;  %26 = sbr.rel (!%p24_p9) target bundleno = 20 (0x14), region = 86 }
 0x372   :  { %1231 = vsyncpa [#allocation5], 1 }
 0x373   :  { %1233 = vsyncpa [#allocation5 + $0x1], 1 }
 0x374   :  { %1234 = vsyncpa [#allocation6], 1 }
 0x375   :  { %1236 = vsyncpa [#allocation6 + $0x1], 1 }

</bundles_post_ra>
